<compile_context>
chip_gen: v7x
topology: tpu7x:2x2x1
jax: 0.10.0
libtpu: 0.0.40
codegen_flags: <defaults>
</compile_context>

<pallas_src>
import jax
import jax.numpy as jnp
from jax.experimental import pallas as pl
from jax.experimental.pallas import tpu as pltpu

LANE = 128    # TPU lane width
SUBLANE = 8   # TPU sublane count


def _round_up(x, m):
    return ((x + m - 1) // m) * m


# -----------------------------------------------------------------------------
# Kernel: the whole 4-layer MLP for one batch tile. Weight/bias refs use a
# constant index_map, so they are resident in VMEM across all grid steps.
# -----------------------------------------------------------------------------
def generator_kernel(x_ref,
                     w1_ref, b1_ref,
                     w2_ref, b2_ref,
                     w3_ref, b3_ref,
                     w4_ref, b4_ref,
                     o_ref):
    # Layer 1: Linear + ReLU  (bf16 operands on the MXU, f32 accumulation;
    # x already arrives in bf16)
    h = jnp.dot(x_ref[...], w1_ref[...], preferred_element_type=jnp.float32)
    h = jnp.maximum(h + b1_ref[...], 0.0)
    # Layer 2: Linear + ReLU
    h = jnp.dot(h.astype(jnp.bfloat16), w2_ref[...],
                preferred_element_type=jnp.float32)
    h = jnp.maximum(h + b2_ref[...], 0.0)
    # Layer 3: Linear + ReLU
    h = jnp.dot(h.astype(jnp.bfloat16), w3_ref[...],
                preferred_element_type=jnp.float32)
    h = jnp.maximum(h + b3_ref[...], 0.0)
    # Layer 4: Linear + Tanh
    h = jnp.dot(h.astype(jnp.bfloat16), w4_ref[...],
                preferred_element_type=jnp.float32)
    o_ref[...] = jnp.tanh(h + b4_ref[...])


# -----------------------------------------------------------------------------
# One-time parameter packing (hoisted out of the per-call path).
# -----------------------------------------------------------------------------
def _is_v5e():
    try:
        kind = jax.devices()[0].device_kind.lower()
    except Exception:
        return False
    return ("v5 lite" in kind) or ("v5e" in kind) or ("v5litepod" in kind)


def pack_generator_params(params, pad_output=None):
    """Cast weights to bf16 (f32 biases) and optionally pad the output feature
    dim to a multiple of 128 for lane-dense stores. Call ONCE and reuse the
    result across forward calls.

    pad_output=None  -> lane-dense 128-wide output on v6e/v7x, natural width
                        on MXU-slot-bound v5e (masked stores are cheaper there
                        than wasted zero-column MACs)."""
    if pad_output is None:
        pad_output = not _is_v5e()

    d_in = int(params["w1"].shape[0])
    d_out = int(params["w4"].shape[1])
    d_out_p = _round_up(d_out, LANE) if pad_output else d_out

    def pad_cols(a, cols, dtype):
        a = a.astype(dtype)
        if a.shape[1] == cols:
            return a
        return jnp.zeros((a.shape[0], cols), dtype).at[:, :a.shape[1]].set(a)

    packed = {
        "w1": params["w1"].astype(jnp.bfloat16),              # (d_in, 128)
        "b1": params["b1"].reshape(1, -1).astype(jnp.float32),
        "w2": params["w2"].astype(jnp.bfloat16),               # (128, 256)
        "b2": params["b2"].reshape(1, -1).astype(jnp.float32),
        "w3": params["w3"].astype(jnp.bfloat16),               # (256, 512)
        "b3": params["b3"].reshape(1, -1).astype(jnp.float32),
        "w4": pad_cols(params["w4"], d_out_p, jnp.bfloat16),   # (512, d_out_p)
        "b4": pad_cols(params["b4"].reshape(1, -1), d_out_p, jnp.float32),
        "d_in": d_in,
        "d_out": d_out,
    }
    return packed


# -----------------------------------------------------------------------------
# Forward pass.
# -----------------------------------------------------------------------------
def _batch_tiling(B, block_b):
    """Pick (batch tile, padded batch). Tiles are multiples of 8 sublanes,
    capped at block_b, and we force >=2 grid steps whenever the batch allows
    it so the 'parallel' axis can be split across v7x's two TensorCores."""
    b8 = _round_up(max(B, 1), SUBLANE)
    if b8 <= SUBLANE:
        return b8, b8
    n_tiles = max(2, -(-b8 // block_b))            # ceil-div, but >= 2 steps
    bm = _round_up(-(-b8 // n_tiles), SUBLANE)
    b_p = _round_up(b8, bm)
    return bm, b_p


def generator_forward(x, packed, *, block_b=512):
    """x: [B, input_dim] float32. packed: output of pack_generator_params."""
    B, d_in = x.shape
    assert d_in == packed["d_in"], (d_in, packed["d_in"])
    d_out = packed["d_out"]
    d_out_p = int(packed["w4"].shape[1])

    bm, b_p = _batch_tiling(B, block_b)
    grid = (b_p // bm,)

    # Stream the input as bf16: pad (batch only) and cast fused into a single
    # materialization; no copy at all when the batch is already tile-aligned.
    x_b = x.astype(jnp.bfloat16)
    if b_p != B:
        x_b = jnp.zeros((b_p, d_in), jnp.bfloat16).at[:B, :].set(x_b)

    const = lambda i: (0, 0)   # weights/biases: same block every grid step

    # Advisory cost estimate using the *padded* work actually done.
    flops = 2 * b_p * (d_in * 128 + 128 * 256 + 256 * 512 + 512 * d_out_p)
    weight_bytes = sum(
        int(packed[k].size) * packed[k].dtype.itemsize
        for k in ("w1", "b1", "w2", "b2", "w3", "b3", "w4", "b4"))
    bytes_accessed = int(x_b.size * x_b.dtype.itemsize
                         + weight_bytes
                         + b_p * d_out_p * 4)
    cost = pl.CostEstimate(flops=int(flops),
                           transcendentals=int(b_p * d_out_p),
                           bytes_accessed=bytes_accessed)

    out_p = pl.pallas_call(
        generator_kernel,
        out_shape=jax.ShapeDtypeStruct((b_p, d_out_p), jnp.float32),
        grid=grid,
        in_specs=[
            pl.BlockSpec((bm, d_in), lambda i: (i, 0)),        # x tile (bf16)
            pl.BlockSpec(packed["w1"].shape, const),
            pl.BlockSpec(packed["b1"].shape, const),
            pl.BlockSpec(packed["w2"].shape, const),
            pl.BlockSpec(packed["b2"].shape, const),
            pl.BlockSpec(packed["w3"].shape, const),
            pl.BlockSpec(packed["b3"].shape, const),
            pl.BlockSpec(packed["w4"].shape, const),
            pl.BlockSpec(packed["b4"].shape, const),
        ],
        out_specs=pl.BlockSpec((bm, d_out_p), lambda i: (i, 0)),
        compiler_params=pltpu.CompilerParams(
            dimension_semantics=("parallel",),
            vmem_limit_bytes=32 * 1024 * 1024),
        cost_estimate=cost,
    )(x_b,
      packed["w1"], packed["b1"],
      packed["w2"], packed["b2"],
      packed["w3"], packed["b3"],
      packed["w4"], packed["b4"])

    return out_p[:B, :d_out]


# -----------------------------------------------------------------------------
# Params init + pure-JAX references.
# -----------------------------------------------------------------------------
def init_generator_params(key, input_dim, output_dim):
    """Deterministic synthetic init (uniform +-1/sqrt(fan_in), roughly torch
    default). Weights stored [in, out], biases [1, out], all f32."""
    dims = [(input_dim, 128), (128, 256), (256, 512), (512, output_dim)]
    params = {}
    for i, (fan_in, fan_out) in enumerate(dims, start=1):
        key, kw, kb = jax.random.split(key, 3)
        bound = 1.0 / jnp.sqrt(jnp.float32(fan_in))
        params[f"w{i}"] = jax.random.uniform(
            kw, (fan_in, fan_out), jnp.float32, minval=-bound, maxval=bound)
        params[f"b{i}"] = jax.random.uniform(
            kb, (1, fan_out), jnp.float32, minval=-bound, maxval=bound)
    return params


def generator_reference_f32(x, params):
    """Pure-JAX full-f32 reference (matches the torch module exactly)."""
    h = jnp.maximum(x @ params["w1"] + params["b1"], 0.0)
    h = jnp.maximum(h @ params["w2"] + params["b2"], 0.0)
    h = jnp.maximum(h @ params["w3"] + params["b3"], 0.0)
    return jnp.tanh(h @ params["w4"] + params["b4"])


def generator_reference_bf16(x, params):
    """Pure-JAX reference emulating the kernel's bf16-operand / f32-accum math."""
    def lin(h, w, b):
        return jnp.dot(h.astype(jnp.bfloat16), w.astype(jnp.bfloat16),
                       preferred_element_type=jnp.float32) + b
    h = jnp.maximum(lin(x, params["w1"], params["b1"]), 0.0)
    h = jnp.maximum(lin(h, params["w2"], params["b2"]), 0.0)
    h = jnp.maximum(lin(h, params["w3"], params["b3"]), 0.0)
    return jnp.tanh(lin(h, params["w4"], params["b4"]))


if __name__ == "__main__":
    key = jax.random.PRNGKey(0)
    key, kx = jax.random.split(key)

    input_dim = 64    # latent dim
    output_dim = 64   # generated sample dim

    params = init_generator_params(key, input_dim, output_dim)
    packed = pack_generator_params(params)   # pack ONCE, reuse across calls

    # Exercise both a single-tile grid (batch=8) and a multi-step, padded
    # batch grid (batch=40 -> two tiles of 24 rows).
    for batch in (8, 40):
        kx, kcur = jax.random.split(kx)
        x = jax.random.normal(kcur, (batch, input_dim), dtype=jnp.float32)

        out = jax.block_until_ready(generator_forward(x, packed))
        assert out.shape == (batch, output_dim)

        # Tight check vs a reference doing the same bf16-operand math.
        ref_bf16 = generator_reference_bf16(x, params)
        assert jnp.allclose(out, ref_bf16, atol=2e-3, rtol=2e-3), (
            batch, float(jnp.max(jnp.abs(out - ref_bf16))))

        # Loose sanity check vs the full-f32 torch-equivalent reference.
        ref_f32 = generator_reference_f32(x, params)
        assert jnp.allclose(out, ref_f32, atol=5e-2, rtol=5e-2), (
            batch, float(jnp.max(jnp.abs(out - ref_f32))))

    print("KERNEL_OK")
</pallas_src>

<mosaic_0001>
module attributes {stable_mosaic.version = 11 : i64} {
  func.func @generator_kernel(%arg0: i32, %arg1: memref<8x64xbf16, #tpu.memory_space<vmem>>, %arg2: memref<64x128xbf16, #tpu.memory_space<vmem>>, %arg3: memref<1x128xf32, #tpu.memory_space<vmem>>, %arg4: memref<128x256xbf16, #tpu.memory_space<vmem>>, %arg5: memref<1x256xf32, #tpu.memory_space<vmem>>, %arg6: memref<256x512xbf16, #tpu.memory_space<vmem>>, %arg7: memref<1x512xf32, #tpu.memory_space<vmem>>, %arg8: memref<512x128xbf16, #tpu.memory_space<vmem>>, %arg9: memref<1x128xf32, #tpu.memory_space<vmem>>, %arg10: memref<8x128xf32, #tpu.memory_space<vmem>>) attributes {dimension_semantics = [#tpu.dimension_semantics<parallel>], iteration_bounds = array<i64: 1>, scalar_prefetch = 0 : i64, scratch_operands = 0 : i64, tpu.core_type = #tpu.core_type<tc>, window_params = [{transform_indices = @transform_0, window_bounds = array<i64: 8, 64>}, {pipeline_mode = #tpu.pipeline_mode<synchronous>, transform_indices = @transform_1, window_bounds = array<i64: 64, 128>}, {pipeline_mode = #tpu.pipeline_mode<synchronous>, transform_indices = @transform_2, window_bounds = array<i64: 1, 128>}, {pipeline_mode = #tpu.pipeline_mode<synchronous>, transform_indices = @transform_3, window_bounds = array<i64: 128, 256>}, {pipeline_mode = #tpu.pipeline_mode<synchronous>, transform_indices = @transform_4, window_bounds = array<i64: 1, 256>}, {pipeline_mode = #tpu.pipeline_mode<synchronous>, transform_indices = @transform_5, window_bounds = array<i64: 256, 512>}, {pipeline_mode = #tpu.pipeline_mode<synchronous>, transform_indices = @transform_6, window_bounds = array<i64: 1, 512>}, {pipeline_mode = #tpu.pipeline_mode<synchronous>, transform_indices = @transform_7, window_bounds = array<i64: 512, 128>}, {pipeline_mode = #tpu.pipeline_mode<synchronous>, transform_indices = @transform_8, window_bounds = array<i64: 1, 128>}, {transform_indices = @transform_9, window_bounds = array<i64: 8, 128>}]} {
    %c0 = arith.constant 0 : index
    %c0_0 = arith.constant 0 : index
    %0 = vector.load %arg1[%c0, %c0_0] : memref<8x64xbf16, #tpu.memory_space<vmem>>, vector<8x64xbf16>
    %c0_1 = arith.constant 0 : index
    %c0_2 = arith.constant 0 : index
    %1 = vector.load %arg2[%c0_1, %c0_2] : memref<64x128xbf16, #tpu.memory_space<vmem>>, vector<64x128xbf16>
    %cst = arith.constant dense<0.000000e+00> : vector<8x128xf32>
    %2 = tpu.matmul %0, %1, %cst {dimension_numbers = #tpu.dot_dimension_numbers<[1], [0], [0], [1], [0, 0, 1, 1], [], []>} : vector<8x64xbf16>, vector<64x128xbf16>, vector<8x128xf32> -> vector<8x128xf32>
    %c0_3 = arith.constant 0 : index
    %c0_4 = arith.constant 0 : index
    %3 = vector.load %arg3[%c0_3, %c0_4] : memref<1x128xf32, #tpu.memory_space<vmem>>, vector<1x128xf32>
    %4 = vector.broadcast %3 : vector<1x128xf32> to vector<8x128xf32>
    %5 = arith.addf %2, %4 : vector<8x128xf32>
    %cst_5 = arith.constant 0.000000e+00 : f32
    %6 = vector.broadcast %cst_5 : f32 to vector<8x128xf32>
    %7 = arith.maximumf %5, %6 : vector<8x128xf32>
    %8 = arith.truncf %7 : vector<8x128xf32> to vector<8x128xbf16>
    %c0_6 = arith.constant 0 : index
    %c0_7 = arith.constant 0 : index
    %9 = vector.load %arg4[%c0_6, %c0_7] : memref<128x256xbf16, #tpu.memory_space<vmem>>, vector<128x256xbf16>
    %cst_8 = arith.constant dense<0.000000e+00> : vector<8x256xf32>
    %10 = tpu.matmul %8, %9, %cst_8 {dimension_numbers = #tpu.dot_dimension_numbers<[1], [0], [0], [1], [0, 0, 1, 1], [], []>} : vector<8x128xbf16>, vector<128x256xbf16>, vector<8x256xf32> -> vector<8x256xf32>
    %c0_9 = arith.constant 0 : index
    %c0_10 = arith.constant 0 : index
    %11 = vector.load %arg5[%c0_9, %c0_10] : memref<1x256xf32, #tpu.memory_space<vmem>>, vector<1x256xf32>
    %12 = vector.broadcast %11 : vector<1x256xf32> to vector<8x256xf32>
    %13 = arith.addf %10, %12 : vector<8x256xf32>
    %cst_11 = arith.constant 0.000000e+00 : f32
    %14 = vector.broadcast %cst_11 : f32 to vector<8x256xf32>
    %15 = arith.maximumf %13, %14 : vector<8x256xf32>
    %16 = arith.truncf %15 : vector<8x256xf32> to vector<8x256xbf16>
    %c0_12 = arith.constant 0 : index
    %c0_13 = arith.constant 0 : index
    %17 = vector.load %arg6[%c0_12, %c0_13] : memref<256x512xbf16, #tpu.memory_space<vmem>>, vector<256x512xbf16>
    %cst_14 = arith.constant dense<0.000000e+00> : vector<8x512xf32>
    %18 = tpu.matmul %16, %17, %cst_14 {dimension_numbers = #tpu.dot_dimension_numbers<[1], [0], [0], [1], [0, 0, 1, 1], [], []>} : vector<8x256xbf16>, vector<256x512xbf16>, vector<8x512xf32> -> vector<8x512xf32>
    %c0_15 = arith.constant 0 : index
    %c0_16 = arith.constant 0 : index
    %19 = vector.load %arg7[%c0_15, %c0_16] : memref<1x512xf32, #tpu.memory_space<vmem>>, vector<1x512xf32>
    %20 = vector.broadcast %19 : vector<1x512xf32> to vector<8x512xf32>
    %21 = arith.addf %18, %20 : vector<8x512xf32>
    %cst_17 = arith.constant 0.000000e+00 : f32
    %22 = vector.broadcast %cst_17 : f32 to vector<8x512xf32>
    %23 = arith.maximumf %21, %22 : vector<8x512xf32>
    %24 = arith.truncf %23 : vector<8x512xf32> to vector<8x512xbf16>
    %c0_18 = arith.constant 0 : index
    %c0_19 = arith.constant 0 : index
    %25 = vector.load %arg8[%c0_18, %c0_19] : memref<512x128xbf16, #tpu.memory_space<vmem>>, vector<512x128xbf16>
    %cst_20 = arith.constant dense<0.000000e+00> : vector<8x128xf32>
    %26 = tpu.matmul %24, %25, %cst_20 {dimension_numbers = #tpu.dot_dimension_numbers<[1], [0], [0], [1], [0, 0, 1, 1], [], []>} : vector<8x512xbf16>, vector<512x128xbf16>, vector<8x128xf32> -> vector<8x128xf32>
    %c0_21 = arith.constant 0 : index
    %c0_22 = arith.constant 0 : index
    %27 = vector.load %arg9[%c0_21, %c0_22] : memref<1x128xf32, #tpu.memory_space<vmem>>, vector<1x128xf32>
    %28 = vector.broadcast %27 : vector<1x128xf32> to vector<8x128xf32>
    %29 = arith.addf %26, %28 : vector<8x128xf32>
    %30 = math.tanh %29 : vector<8x128xf32>
    %c0_23 = arith.constant 0 : index
    %c0_24 = arith.constant 0 : index
    %31 = vector.load %arg10[%c0_23, %c0_24] : memref<8x128xf32, #tpu.memory_space<vmem>>, vector<8x128xf32>
    tpu.vector_store %arg10[%c0_23, %c0_24], %30 {strides = array<i32>} : memref<8x128xf32, #tpu.memory_space<vmem>>, vector<8x128xf32>,
    return
  }
  func.func @transform_0(%arg0: i32) -> (i32, i32) {
    %c0_i32 = arith.constant 0 : i32
    %c0_i32_0 = arith.constant 0 : i32
    return %arg0, %c0_i32 : i32, i32
  }
  func.func @transform_1(%arg0: i32) -> (i32, i32) {
    %c0_i32 = arith.constant 0 : i32
    %c0_i32_0 = arith.constant 0 : i32
    %c0_i32_1 = arith.constant 0 : i32
    return %c0_i32, %c0_i32_0 : i32, i32
  }
  func.func @transform_2(%arg0: i32) -> (i32, i32) {
    %c0_i32 = arith.constant 0 : i32
    %c0_i32_0 = arith.constant 0 : i32
    %c0_i32_1 = arith.constant 0 : i32
    return %c0_i32, %c0_i32_0 : i32, i32
  }
  func.func @transform_3(%arg0: i32) -> (i32, i32) {
    %c0_i32 = arith.constant 0 : i32
    %c0_i32_0 = arith.constant 0 : i32
    %c0_i32_1 = arith.constant 0 : i32
    return %c0_i32, %c0_i32_0 : i32, i32
  }
  func.func @transform_4(%arg0: i32) -> (i32, i32) {
    %c0_i32 = arith.constant 0 : i32
    %c0_i32_0 = arith.constant 0 : i32
    %c0_i32_1 = arith.constant 0 : i32
    return %c0_i32, %c0_i32_0 : i32, i32
  }
  func.func @transform_5(%arg0: i32) -> (i32, i32) {
    %c0_i32 = arith.constant 0 : i32
    %c0_i32_0 = arith.constant 0 : i32
    %c0_i32_1 = arith.constant 0 : i32
    return %c0_i32, %c0_i32_0 : i32, i32
  }
  func.func @transform_6(%arg0: i32) -> (i32, i32) {
    %c0_i32 = arith.constant 0 : i32
    %c0_i32_0 = arith.constant 0 : i32
    %c0_i32_1 = arith.constant 0 : i32
    return %c0_i32, %c0_i32_0 : i32, i32
  }
  func.func @transform_7(%arg0: i32) -> (i32, i32) {
    %c0_i32 = arith.constant 0 : i32
    %c0_i32_0 = arith.constant 0 : i32
    %c0_i32_1 = arith.constant 0 : i32
    return %c0_i32, %c0_i32_0 : i32, i32
  }
  func.func @transform_8(%arg0: i32) -> (i32, i32) {
    %c0_i32 = arith.constant 0 : i32
    %c0_i32_0 = arith.constant 0 : i32
    %c0_i32_1 = arith.constant 0 : i32
    return %c0_i32, %c0_i32_0 : i32, i32
  }
  func.func @transform_9(%arg0: i32) -> (i32, i32) {
    %c0_i32 = arith.constant 0 : i32
    %c0_i32_0 = arith.constant 0 : i32
    return %arg0, %c0_i32 : i32, i32
  }
}

</mosaic_0001>

<bundles_post_ra>
// kernel: tpu_custom_call.1
= control target key start
LH: loop header
LB: loop body
LE: loop exit
PB: predicated region body
PF: predicated region fallthrough
CT: control target
= control target key end

     0   :  { %14 = vsyncpa [#allocation3], 0  ;;  %s1866_s0 = inlined_call_operand.hbm [shape: bf16[8,64], index: 0, kind: input, shape index: {}]   ;;  %s1867_s1 = inlined_call_operand.hbm [shape: bf16[64,128], index: 1, kind: input, shape index: {}]   ;;  %s1868_s2 = inlined_call_operand.vmem [shape: f32[1,128], index: 2, kind: input, shape index: {}]   ;;  %s1869_s3 = inlined_call_operand.hbm [shape: bf16[128,256], index: 3, kind: input, shape index: {}]   ;;  %s1870_s4 = inlined_call_operand.vmem [shape: f32[1,256], index: 4, kind: input, shape index: {}]   ;;  %s1871_s5 = inlined_call_operand.hbm [shape: bf16[256,512], index: 5, kind: input, shape index: {}]   ;;  %s1872_s6 = inlined_call_operand.vmem [shape: f32[1,512], index: 6, kind: input, shape index: {}]   ;;  %s1873_s7 = inlined_call_operand.hbm [shape: bf16[512,128], index: 7, kind: input, shape index: {}]   ;;  %s1874_s8 = inlined_call_operand.vmem [shape: f32[1,128], index: 8, kind: input, shape index: {}]   ;;  %s1875_s9 = inlined_call_operand.hbm [shape: f32[8,128], index: 9, kind: output, shape index: {}]  }
   0x1   :  { %15 = vsyncpa [#allocation6], 0 }
   0x2   :  { %16 = vsyncpa [#allocation9], 0 }
   0x3   :  { %17 = vsyncpa [#allocation4], 0  ;;  %s1690_s30 = smov [#allocation5]   ;;  %s1550_s13 = scalar_lea.hbm %s1867_s1, 512 }
   0x4   :  { %s33_s10 = sshll.u32 %s1690_s30, 4  ;;  %p1551_p0 = scmp.ne.s32.totalorder %s1867_s1, %s1550_s13  ;;  %s34_s10 = int_to_ptr.vmem [resolvable:$true] %s33_s10 }
   0x5   :  { %p1554_p1 = scmp.lt.u32.totalorder %s1550_s13, %s1867_s1 }
   0x7   :  { %p1556_p2 = pnand %p1554_p1, %p1551_p0 }
   0x9   :  { %1559 = shalt.err (!%p1556_p2)
}
   0xa   :  { %s1560_s18 = scalar_lea.vmem %s34_s10, 512  ;;  %p1565_p4 = scmp.lt.s32.totalorder %s34_s10, %s34_s10 }
   0xb   :  { %p1561_p3 = scmp.ne.s32.totalorder %s34_s10, %s1560_s18  ;;  %p1566_p5 = scmp.lt.s32.totalorder %s1560_s18, %s1560_s18 }
   0xd   :  { %p1567_p6 = por %p1566_p5, %p1565_p4 }
   0xf   :  { %p1568_p7 = pnand %p1567_p6, %p1561_p3 }
  0x11   :  { %1571 = shalt.err (!%p1568_p7)
}
  0x12   :  { %s1691_s19 = smov 64   ;;  %s1692_s20 = smov 4  }
  0x13   :  { %39 = dma.hbm_to_vmem [thread:$0]  %s1867_s1, 512, %s34_s10, [#allocation6], %s1691_s19, %s1691_s19, %s1692_s20  }
  0x14   :  { %s1693_s23 = smov [#allocation8]   ;;  %s1572_s27 = scalar_lea.hbm %s1871_s5, 8192 }
  0x15   :  { %s61_s24 = sshll.u32 %s1693_s23, 4  ;;  %p1573_p8 = scmp.ne.s32.totalorder %s1871_s5, %s1572_s27  ;;  %s62_s24 = int_to_ptr.vmem [resolvable:$true] %s61_s24 }
  0x16   :  { %p1576_p9 = scmp.lt.u32.totalorder %s1572_s27, %s1871_s5 }
  0x18   :  { %p1578_p10 = pnand %p1576_p9, %p1573_p8 }
  0x1a   :  { %1581 = shalt.err (!%p1578_p10)
}
  0x1b   :  { %s1582_s12 = scalar_lea.vmem %s62_s24, 8192  ;;  %p1587_p12 = scmp.lt.s32.totalorder %s62_s24, %s62_s24 }
  0x1c   :  { %p1583_p11 = scmp.ne.s32.totalorder %s62_s24, %s1582_s12  ;;  %p1588_p13 = scmp.lt.s32.totalorder %s1582_s12, %s1582_s12 }
  0x1e   :  { %p1589_p0 = por %p1588_p13, %p1587_p12 }
  0x20   :  { %p1590_p1 = pnand %p1589_p0, %p1583_p11 }
  0x22   :  { %1593 = shalt.err (!%p1590_p1)
}
  0x23   :  { %s1694_s1 = smov 256   ;;  %s1695_s10 = smov 16  }
  0x24   :  { %67 = dma.hbm_to_vmem [thread:$0]  %s1871_s5, 8192, %s62_s24, [#allocation9], %s1694_s1, %s1694_s1, %s1695_s10  }
  0x25   :  { %s1696_s15 = smov [#allocation2]   ;;  %s1697_s17 = smov [#allocation7]  }
  0x26   :  { %s24_s16 = sshll.u32 %s1696_s15, 4  ;;  %s47_s18 = sshll.u32 %s1697_s17, 4  ;;  %s25_s16 = int_to_ptr.vmem [resolvable:$true] %s24_s16  ;;  %s1782_s18 = int_to_ptr.vmem [resolvable:$true] %s47_s18 }
  0x27   :  { %s1594_s23 = scalar_lea.hbm %s1866_s0, 64 }
  0x28   :  { %p1595_p2 = scmp.ne.s32.totalorder %s1866_s0, %s1594_s23  ;;  %p1598_p3 = scmp.lt.u32.totalorder %s1594_s23, %s1866_s0 }
  0x2a   :  { %p1600_p4 = pnand %p1598_p3, %p1595_p2 }
  0x2c   :  { %1603 = shalt.err (!%p1600_p4)
}
  0x2d   :  { %s1604_s5 = scalar_lea.vmem %s25_s16, 64  ;;  %p1609_p6 = scmp.lt.s32.totalorder %s25_s16, %s25_s16 }
  0x2e   :  { %p1605_p5 = scmp.ne.s32.totalorder %s25_s16, %s1604_s5  ;;  %p1610_p7 = scmp.lt.s32.totalorder %s1604_s5, %s1604_s5 }
  0x30   :  { %p1611_p8 = por %p1610_p7, %p1609_p6 }
  0x32   :  { %p1612_p9 = pnand %p1611_p8, %p1605_p5 }
  0x34   :  { %1615 = shalt.err (!%p1612_p9)
}
  0x35   :  { %27 = dma.hbm_to_vmem [thread:$0]  %s1866_s0, 64, %s25_s16, [#allocation3]  }
  0x36   :  { %s1616_s12 = scalar_lea.hbm %s1869_s3, 2048 }
  0x37   :  { %p1617_p10 = scmp.ne.s32.totalorder %s1869_s3, %s1616_s12  ;;  %p1620_p11 = scmp.lt.u32.totalorder %s1616_s12, %s1869_s3 }
  0x39   :  { %p1622_p12 = pnand %p1620_p11, %p1617_p10 }
  0x3b   :  { %1625 = shalt.err (!%p1622_p12)
}
  0x3c   :  { %s1626_s15 = scalar_lea.vmem %s1782_s18, 2048  ;;  %p1631_p0 = scmp.lt.s32.totalorder %s1782_s18, %s1782_s18 }
  0x3d   :  { %p1627_p13 = scmp.ne.s32.totalorder %s1782_s18, %s1626_s15  ;;  %p1632_p1 = scmp.lt.s32.totalorder %s1626_s15, %s1626_s15 }
  0x3f   :  { %p1633_p2 = por %p1632_p1, %p1631_p0 }
  0x41   :  { %p1634_p3 = pnand %p1633_p2, %p1627_p13 }
  0x43   :  { %1637 = shalt.err (!%p1634_p3)
}
  0x44   :  { %s1698_s0 = smov 128   ;;  %s1699_s16 = smov 8  }
  0x45   :  { %53 = dma.hbm_to_vmem [thread:$0]  %s1869_s3, 2048, %s1782_s18, [#allocation6], %s1698_s0, %s1698_s0, %s1699_s16  }
  0x46   :  { %s1700_s22 = smov [#allocation10]   ;;  %s1638_s27 = scalar_lea.hbm %s1873_s7, 4096 }
  0x47   :  { %s75_s23 = sshll.u32 %s1700_s22, 4  ;;  %p1639_p4 = scmp.ne.s32.totalorder %s1873_s7, %s1638_s27  ;;  %s76_s23 = int_to_ptr.vmem [resolvable:$true] %s75_s23 }
  0x48   :  { %p1642_p5 = scmp.lt.u32.totalorder %s1638_s27, %s1873_s7 }
  0x4a   :  { %p1644_p6 = pnand %p1642_p5, %p1639_p4 }
  0x4c   :  { %1647 = shalt.err (!%p1644_p6)
}
  0x4d   :  { %s1648_s30 = scalar_lea.vmem %s76_s23, 4096  ;;  %p1653_p8 = scmp.lt.s32.totalorder %s76_s23, %s76_s23 }
  0x4e   :  { %p1649_p7 = scmp.ne.s32.totalorder %s76_s23, %s1648_s30  ;;  %p1654_p9 = scmp.lt.s32.totalorder %s1648_s30, %s1648_s30 }
  0x50   :  { %p1655_p10 = por %p1654_p9, %p1653_p8 }
  0x52   :  { %p1656_p11 = pnand %p1655_p10, %p1649_p7 }
  0x54   :  { %1659 = shalt.err (!%p1656_p11)
}
  0x55   :  { %81 = dma.hbm_to_vmem [thread:$0]  %s1873_s7, 4096, %s76_s23, [#allocation9], %s1691_s19, %s1691_s19, %s1692_s20  }
  0x56   :  { %1682 = dma.done.wait [#allocation3], 64  }
  0x57   :  { %1683 = vsyncadd [#allocation3], 4294967232 }
  0x58   :  { %1684 = dma.done.wait [#allocation6], 2560  }
  0x59   :  { %1685 = vsyncadd [#allocation6], 4294964736 }
  0x5a   :  { %1686 = dma.done.wait [#allocation9], 12288  }
  0x5b   :  { %1687 = vsyncadd [#allocation9], 4294955008  ;;  %v1701_v0 = vmov 0.0   ;;  %vm1702_vm0 = vmmov 0   ;;  %v1392_v1 = vld [vmem:[#allocation5] sm:$0xff]   ;;  %v1393_v2 = vld [vmem:[#allocation5 + $0x8] sm:$0xff]  }
  0x5c   :  { %1365 = vmatprep.subr.bf16.mxu0 %v1701_v0  ;;  %1373 = vmatprep.mubr.msk.bf16.mxu0 %vm1702_vm0, %v1701_v0  ;;  %v1396_v3 = vld [vmem:[#allocation7 + $0x4] ss:$8 sps:$4 sm:$0xff]   ;;  %v1398_v4 = vld [vmem:[#allocation7] ss:$8 sps:$4 sm:$0xff]   ;;  %v1394_v5 = vld [vmem:[#allocation5 + $0x10] sm:$0xff]   ;;  %vm140_vm1 = vcmask 523264  }
  0x5d   :  { %1366 = vmatpush3.bf16.msra.mxu0 %v1392_v1  ;;  %v1399_v6 = vld [vmem:[#allocation7 + $0x14] ss:$8 sps:$4 sm:$0xff]   ;;  %294 = vmatprep.subr.bf16.mxu1 %v1396_v3  ;;  %v1401_v7 = vld [vmem:[#allocation7 + $0x10] ss:$8 sps:$4 sm:$0xff]   ;;  %v1402_v8 = vld [vmem:[#allocation7 + $0x24] ss:$8 sps:$4 sm:$0xff]  }
  0x5e   :  { %1367 = vmatprep.subr.bf16.mxu0 %v1701_v0  ;;  %295 = vmatpush1.bf16.msra.mxu1 %v1398_v4  ;;  %v1395_v9 = vld [vmem:[#allocation5 + $0x18] sm:$0xff]   ;;  %v1404_v10 = vld [vmem:[#allocation7 + $0x20] ss:$8 sps:$4 sm:$0xff]   ;;  %v1408_v14 = vld [vmem:[#allocation7 + $0x44] ss:$8 sps:$4 sm:$0xff]   ;;  %v1703_v22 = vmov 0  }
  0x5f   :  { %296 = vmatprep.subr.bf16.mxu1 %v1399_v6  ;;  %v100_v11 = vld [vmem:[#allocation2] sm:$0xf]  ;;  %v1407_v13 = vld [vmem:[#allocation7 + $0x30] ss:$8 sps:$4 sm:$0xff]   ;;  %v1410_v15 = vld [vmem:[#allocation7 + $0x40] ss:$8 sps:$4 sm:$0xff]   ;;  %326 = vmatprep.mubr.bf16.mxu1 %v1703_v22 }
  0x60   :  { %v1405_v12 = vld [vmem:[#allocation7 + $0x34] ss:$8 sps:$4 sm:$0xff]   ;;  %v1413_v17 = vld [vmem:[#allocation7 + $0x50] ss:$8 sps:$4 sm:$0xff]   ;;  %v1414_v18 = vld [vmem:[#allocation7 + $0x64] ss:$8 sps:$4 sm:$0xff]  }
  0x61   :  { %1368 = vmatpush3.bf16.msra.mxu0 %v1393_v2  ;;  %v1411_v16 = vld [vmem:[#allocation7 + $0x54] ss:$8 sps:$4 sm:$0xff]   ;;  %v1416_v19 = vld [vmem:[#allocation7 + $0x60] ss:$8 sps:$4 sm:$0xff]   ;;  %v1419_v21 = vld [vmem:[#allocation7 + $0x70] ss:$8 sps:$4 sm:$0xff]  }
  0x62   :  { %1369 = vmatprep.subr.bf16.mxu0 %v1701_v0  ;;  %297 = vmatpush1.bf16.msra.mxu1 %v1401_v7  ;;  %v1417_v20 = vld [vmem:[#allocation7 + $0x74] ss:$8 sps:$4 sm:$0xff]   ;;  %v1420_v23 = vld [vmem:[#allocation8] ss:$16 sps:$4 sm:$0xff]   ;;  %v1423_v59 = vld [vmem:[#allocation8 + $0x8] ss:$16 sps:$4 sm:$0xff]  }
  0x63   :  { %298 = vmatprep.subr.bf16.mxu1 %v1402_v8  ;;  %v1422_v24 = vld [vmem:[#allocation8 + $0x4] ss:$16 sps:$4 sm:$0xff]   ;;  %v1425_v25 = vld [vmem:[#allocation8 + $0xc] ss:$16 sps:$4 sm:$0xff]   ;;  %v1426_v27 = vld [vmem:[#allocation8 + $0x20] ss:$16 sps:$4 sm:$0xff]  }
  0x64   :  { %v1428_v26 = vld [vmem:[#allocation8 + $0x24] ss:$16 sps:$4 sm:$0xff]   ;;  %v1432_v29 = vld [vmem:[#allocation8 + $0x40] ss:$16 sps:$4 sm:$0xff]   ;;  %v1197_v52 = vld [vmem:[%s1868_s2] ss:$0 sm:$0xff] }
  0x65   :  { %1370 = vmatpush3.bf16.msra.mxu0 %v1394_v5  ;;  %v1434_v28 = vld [vmem:[#allocation8 + $0x44] ss:$16 sps:$4 sm:$0xff]   ;;  %v1438_v31 = vld [vmem:[#allocation8 + $0x60] ss:$16 sps:$4 sm:$0xff]   ;;  %v1431_v61 = vld [vmem:[#allocation8 + $0x2c] ss:$16 sps:$4 sm:$0xff]  }
  0x66   :  { %1371 = vmatprep.subr.bf16.mxu0 %v1701_v0  ;;  %299 = vmatpush1.bf16.msra.mxu1 %v1404_v10  ;;  %v1440_v30 = vld [vmem:[#allocation8 + $0x64] ss:$16 sps:$4 sm:$0xff]   ;;  %v1444_v33 = vld [vmem:[#allocation8 + $0x80] ss:$16 sps:$4 sm:$0xff]   ;;  %v1429_v62 = vld [vmem:[#allocation8 + $0x28] ss:$16 sps:$4 sm:$0xff]  }
  0x67   :  { %300 = vmatprep.subr.bf16.mxu1 %v1405_v12  ;;  %v1446_v32 = vld [vmem:[#allocation8 + $0x84] ss:$16 sps:$4 sm:$0xff]   ;;  %v1450_v35 = vld [vmem:[#allocation8 + $0xa0] ss:$16 sps:$4 sm:$0xff]   ;;  %v1437_v63 = vld [vmem:[#allocation8 + $0x4c] ss:$16 sps:$4 sm:$0xff]  }
  0x68   :  { %v1452_v34 = vld [vmem:[#allocation8 + $0xa4] ss:$16 sps:$4 sm:$0xff]   ;;  %v1456_v37 = vld [vmem:[#allocation8 + $0xc0] ss:$16 sps:$4 sm:$0xff]   ;;  %v1435_v0 = vld [vmem:[#allocation8 + $0x48] ss:$16 sps:$4 sm:$0xff]  }
  0x69   :  { %1372 = vmatpush3.bf16.msra.mxu0 %v1395_v9  ;;  %v1458_v36 = vld [vmem:[#allocation8 + $0xc4] ss:$16 sps:$4 sm:$0xff]   ;;  %v1462_v39 = vld [vmem:[#allocation8 + $0xe0] ss:$16 sps:$4 sm:$0xff]   ;;  %v1443_v1 = vld [vmem:[#allocation8 + $0x6c] ss:$16 sps:$4 sm:$0xff]  }
  0x6a   :  { %301 = vmatpush1.bf16.msra.mxu1 %v1407_v13  ;;  %745 = vmatprep.subr.bf16.mxu0 %v1422_v24  ;;  %v1464_v38 = vld [vmem:[#allocation8 + $0xe4] ss:$16 sps:$4 sm:$0xff]   ;;  %v1468_v41 = vld [vmem:[#allocation8 + $0x100] ss:$16 sps:$4 sm:$0xff]   ;;  %v1441_v2 = vld [vmem:[#allocation8 + $0x68] ss:$16 sps:$4 sm:$0xff]  }
  0x6b   :  { %302 = vmatprep.subr.bf16.mxu1 %v1408_v14  ;;  %v1470_v40 = vld [vmem:[#allocation8 + $0x104] ss:$16 sps:$4 sm:$0xff]   ;;  %v1474_v43 = vld [vmem:[#allocation8 + $0x120] ss:$16 sps:$4 sm:$0xff]   ;;  %v1449_v3 = vld [vmem:[#allocation8 + $0x8c] ss:$16 sps:$4 sm:$0xff]  }
  0x6c   :  { %1374 = vmatmul.mubr.msk.bf16.vlgmr.msra.gmra.mrb[0].mxu0 %vm140_vm1, %v100_v11  ;;  %v1476_v42 = vld [vmem:[#allocation8 + $0x124] ss:$16 sps:$4 sm:$0xff]   ;;  %v1480_v45 = vld [vmem:[#allocation8 + $0x140] ss:$16 sps:$4 sm:$0xff]   ;;  %v1447_v4 = vld [vmem:[#allocation8 + $0x88] ss:$16 sps:$4 sm:$0xff]  }
  0x6d   :  { %746 = vmatpush1.bf16.msra.mxu0 %v1420_v23  ;;  %v1482_v44 = vld [vmem:[#allocation8 + $0x144] ss:$16 sps:$4 sm:$0xff]   ;;  %v1486_v47 = vld [vmem:[#allocation8 + $0x160] ss:$16 sps:$4 sm:$0xff]   ;;  %v1455_v5 = vld [vmem:[#allocation8 + $0xac] ss:$16 sps:$4 sm:$0xff]  }
  0x6e   :  { %303 = vmatpush1.bf16.msra.mxu1 %v1410_v15  ;;  %747 = vmatprep.subr.bf16.mxu0 %v1428_v26  ;;  %v1488_v46 = vld [vmem:[#allocation8 + $0x164] ss:$16 sps:$4 sm:$0xff]   ;;  %v1492_v49 = vld [vmem:[#allocation8 + $0x180] ss:$16 sps:$4 sm:$0xff]   ;;  %v1453_v6 = vld [vmem:[#allocation8 + $0xa8] ss:$16 sps:$4 sm:$0xff]  }
  0x6f   :  { %304 = vmatprep.subr.bf16.mxu1 %v1411_v16  ;;  %v1494_v48 = vld [vmem:[#allocation8 + $0x184] ss:$16 sps:$4 sm:$0xff]   ;;  %v1498_v51 = vld [vmem:[#allocation8 + $0x1a0] ss:$16 sps:$4 sm:$0xff]   ;;  %v1461_v7 = vld [vmem:[#allocation8 + $0xcc] ss:$16 sps:$4 sm:$0xff]  }
  0x70   :  { %v1500_v50 = vld [vmem:[#allocation8 + $0x1a4] ss:$16 sps:$4 sm:$0xff]   ;;  %v1459_v8 = vld [vmem:[#allocation8 + $0xc8] ss:$16 sps:$4 sm:$0xff]   ;;  %v1467_v9 = vld [vmem:[#allocation8 + $0xec] ss:$16 sps:$4 sm:$0xff]  }
  0x71   :  { %748 = vmatpush1.bf16.msra.mxu0 %v1426_v27  ;;  %v1465_v10 = vld [vmem:[#allocation8 + $0xe8] ss:$16 sps:$4 sm:$0xff]   ;;  %v1473_v11 = vld [vmem:[#allocation8 + $0x10c] ss:$16 sps:$4 sm:$0xff]   ;;  %v1506_v23 = vld [vmem:[#allocation8 + $0x1c4] ss:$16 sps:$4 sm:$0xff]  }
  0x72   :  { %305 = vmatpush1.bf16.msra.mxu1 %v1413_v17  ;;  %749 = vmatprep.subr.bf16.mxu0 %v1434_v28  ;;  %v1471_v12 = vld [vmem:[#allocation8 + $0x108] ss:$16 sps:$4 sm:$0xff]   ;;  %v1479_v13 = vld [vmem:[#allocation8 + $0x12c] ss:$16 sps:$4 sm:$0xff]   ;;  %v1512_v27 = vld [vmem:[#allocation8 + $0x1e4] ss:$16 sps:$4 sm:$0xff]  }
  0x73   :  { %306 = vmatprep.subr.bf16.mxu1 %v1414_v18  ;;  %v1477_v14 = vld [vmem:[#allocation8 + $0x128] ss:$16 sps:$4 sm:$0xff]   ;;  %v1485_v15 = vld [vmem:[#allocation8 + $0x14c] ss:$16 sps:$4 sm:$0xff]   ;;  %s1704_s1 = smov [#allocation11]  }
  0x74   :  { %v1483_v16 = vld [vmem:[#allocation8 + $0x148] ss:$16 sps:$4 sm:$0xff]   ;;  %v1491_v17 = vld [vmem:[#allocation8 + $0x16c] ss:$16 sps:$4 sm:$0xff]   ;;  %s1186_s10 = sshll.u32 %s1704_s1, 4  ;;  %s1187_s10 = int_to_ptr.vmem [resolvable:$true] %s1186_s10 }
  0x75   :  { %750 = vmatpush1.bf16.msra.mxu0 %v1432_v29  ;;  %v1489_v18 = vld [vmem:[#allocation8 + $0x168] ss:$16 sps:$4 sm:$0xff]   ;;  %v1509_v24 = vld [vmem:[#allocation8 + $0x1cc] ss:$16 sps:$4 sm:$0xff]   ;;  %v1510_v29 = vld [vmem:[#allocation8 + $0x1e0] ss:$16 sps:$4 sm:$0xff]   ;;  %p1665_p13 = scmp.lt.s32.totalorder %s1187_s10, %s1187_s10 }
  0x76   :  { %307 = vmatpush1.bf16.msra.mxu1 %v1416_v19  ;;  %751 = vmatprep.subr.bf16.mxu0 %v1440_v30  ;;  %v1497_v19 = vld [vmem:[#allocation8 + $0x18c] ss:$16 sps:$4 sm:$0xff]   ;;  %v1501_v22 = vld [vmem:[#allocation8 + $0x1a8] ss:$16 sps:$4 sm:$0xff]   ;;  %s1660_s13 = scalar_lea.vmem %s1187_s10, 128 }
  0x77   :  { %308 = vmatprep.subr.bf16.mxu1 %v1417_v20  ;;  %v1495_v20 = vld [vmem:[#allocation8 + $0x188] ss:$16 sps:$4 sm:$0xff]   ;;  %v1515_v28 = vld [vmem:[#allocation8 + $0x1ec] ss:$16 sps:$4 sm:$0xff]   ;;  %p1661_p12 = scmp.ne.s32.totalorder %s1187_s10, %s1660_s13  ;;  %p1666_p0 = scmp.lt.s32.totalorder %s1660_s13, %s1660_s13 }
  0x78   :  { %v1507_v26 = vld [vmem:[#allocation8 + $0x1c8] ss:$16 sps:$4 sm:$0xff]  }
  0x79   :  { %752 = vmatpush1.bf16.msra.mxu0 %v1438_v31  ;;  %v1513_v30 = vld [vmem:[#allocation8 + $0x1e8] ss:$16 sps:$4 sm:$0xff]   ;;  %v1516_v31 = vld [vmem:[#allocation10 + $0x40] sm:$0xff]   ;;  %p1667_p1 = por %p1666_p0, %p1665_p13 }
  0x7a   :  { %309 = vmatpush1.bf16.msra.mxu1 %v1419_v21  ;;  %753 = vmatprep.subr.bf16.mxu0 %v1446_v32  ;;  %v1503_v21 = vld [vmem:[#allocation8 + $0x1ac] ss:$16 sps:$4 sm:$0xff]   ;;  %v1517_v32 = vld [vmem:[#allocation10 + $0xc0] sm:$0xff]  }
  0x7b   :  { %786 = vmatprep.subr.bf16.mxu1 %v1425_v25  ;;  %v1504_v25 = vld [vmem:[#allocation8 + $0x1c0] ss:$16 sps:$4 sm:$0xff]   ;;  %p1668_p2 = pnand %p1667_p1, %p1661_p12 }
  0x7d   :  { %754 = vmatpush1.bf16.msra.mxu0 %v1444_v33  ;;  %v204_v33 = vlaneseq }
  0x7e   :  { %755 = vmatprep.subr.bf16.mxu0 %v1452_v34 }
  0x7f   :  { %v1831_v34 = vshrl.u32 %v204_v33, 7 }
  0x81   :  { %756 = vmatpush1.bf16.msra.mxu0 %v1450_v35  ;;  %v206_v35 = vsub.s32 0, %v1831_v34 }
  0x82   :  { %757 = vmatprep.subr.bf16.mxu0 %v1458_v36  ;;  %v202_v36 = vld [vmem:[%s1870_s4] sm:$0x3] }
  0x85   :  { %758 = vmatpush1.bf16.msra.mxu0 %v1456_v37  ;;  %v210_v37 = vsub.s32 1, %v1831_v34 }
  0x86   :  { %759 = vmatprep.subr.bf16.mxu0 %v1464_v38  ;;  %v207_v38 = vrot.slane %v202_v36, %v206_v35 }
  0x89   :  { %760 = vmatpush1.bf16.msra.mxu0 %v1462_v39  ;;  %v211_v39 = vrot.slane %v202_v36, %v210_v37 }
  0x8a   :  { %761 = vmatprep.subr.bf16.mxu0 %v1470_v40 }
  0x8d   :  { %762 = vmatpush1.bf16.msra.mxu0 %v1468_v41 }
  0x8e   :  { %763 = vmatprep.subr.bf16.mxu0 %v1476_v42 }
  0x91   :  { %764 = vmatpush1.bf16.msra.mxu0 %v1474_v43 }
  0x92   :  { %765 = vmatprep.subr.bf16.mxu0 %v1482_v44 }
  0x95   :  { %766 = vmatpush1.bf16.msra.mxu0 %v1480_v45 }
  0x96   :  { %767 = vmatprep.subr.bf16.mxu0 %v1488_v46 }
  0x99   :  { %768 = vmatpush1.bf16.msra.mxu0 %v1486_v47 }
  0x9a   :  { %769 = vmatprep.subr.bf16.mxu0 %v1494_v48 }
  0x9d   :  { %770 = vmatpush1.bf16.msra.mxu0 %v1492_v49  ;;  %v1518_v49 = vld [vmem:[#allocation10] sm:$0xff]  }
  0x9e   :  { %771 = vmatprep.subr.bf16.mxu0 %v1500_v50  ;;  %v1519_v50 = vld [vmem:[#allocation10 + $0x80] sm:$0xff]  }
  0xa1   :  { %772 = vmatpush1.bf16.msra.mxu0 %v1498_v51 }
  0xa2   :  { %773 = vmatprep.subr.bf16.mxu0 %v1506_v23 }
  0xa5   :  { %774 = vmatpush1.bf16.msra.mxu0 %v1504_v25 }
  0xa6   :  { %775 = vmatprep.subr.bf16.mxu0 %v1512_v27 }
  0xa9   :  { %776 = vmatpush1.bf16.msra.mxu0 %v1510_v29 }
  0xaa   :  { %1321 = vmatprep.subr.bf16.mxu0 %v1516_v31 }
 0x13f   :  { %v178_v53 = vpop.f32.mrb[0].mxu0 }
 0x140   :  { %v179_v54 = vadd.f32 %v1197_v52, %v178_v53  ;;  %v1375_v55 = vpop.f32.mrb[1].mxu0  ;;  %v1520_v52 = vld [vmem:[#allocation10 + $0x48] sm:$0xff]  }
 0x141   :  { %v181_v56 = vpop.f32.mrb[2].mxu0  ;;  %v1521_v53 = vld [vmem:[#allocation10 + $0xc8] sm:$0xff]  }
 0x142   :  { %v184_v57 = vmax.f32 %v179_v54, 0.0  ;;  %v1376_v58 = vpop.f32.mrb[3].mxu0  ;;  %v1522_v54 = vld [vmem:[#allocation10 + $0x8] sm:$0xff]   ;;  %v1524_v56 = vld [vmem:[#allocation10 + $0x50] sm:$0xff]  }
 0x143   :  { %v1523_v55 = vld [vmem:[#allocation10 + $0x88] sm:$0xff]   ;;  %v1526_v58 = vld [vmem:[#allocation10 + $0x10] sm:$0xff]  }
 0x144   :  { %v185_v60 = vpack.c.bf16 %v184_v57, %v184_v57  ;;  %v1525_v57 = vld [vmem:[#allocation10 + $0xd0] sm:$0xff]  }
 0x146   :  { %327 = vmatmul.mubr.bf16.vlgmr.msra.gmra.mrb[0].mxu1 %v185_v60  ;;  %v1528_v60 = vld [vmem:[#allocation10 + $0x58] sm:$0xff]  }
 0x147   :  { %787 = vmatpush1.bf16.msra.mxu1 %v1423_v59  ;;  %v1527_v59 = vld [vmem:[#allocation10 + $0x90] sm:$0xff]  }
 0x148   :  { %788 = vmatprep.subr.bf16.mxu1 %v1431_v61  ;;  %v1529_v61 = vld [vmem:[#allocation10 + $0xd8] sm:$0xff]  }
 0x14b   :  { %789 = vmatpush1.bf16.msra.mxu1 %v1429_v62  ;;  %v1530_v62 = vld [vmem:[#allocation10 + $0x18] sm:$0xff]  }
 0x14c   :  { %790 = vmatprep.subr.bf16.mxu1 %v1437_v63  ;;  %v1531_v63 = vld [vmem:[#allocation10 + $0x98] sm:$0xff]  }
 0x14f   :  { %791 = vmatpush1.bf16.msra.mxu1 %v1435_v0  ;;  %v1532_v0 = vld [vmem:[#allocation10 + $0x60] sm:$0xff]  }
 0x150   :  { %792 = vmatprep.subr.bf16.mxu1 %v1443_v1  ;;  %v1533_v1 = vld [vmem:[#allocation10 + $0xe0] sm:$0xff]  }
 0x153   :  { %793 = vmatpush1.bf16.msra.mxu1 %v1441_v2  ;;  %v1534_v2 = vld [vmem:[#allocation10 + $0x20] sm:$0xff]  }
 0x154   :  { %794 = vmatprep.subr.bf16.mxu1 %v1449_v3  ;;  %v1535_v3 = vld [vmem:[#allocation10 + $0xa0] sm:$0xff]  }
 0x157   :  { %795 = vmatpush1.bf16.msra.mxu1 %v1447_v4  ;;  %v1536_v4 = vld [vmem:[#allocation10 + $0x68] sm:$0xff]  }
 0x158   :  { %796 = vmatprep.subr.bf16.mxu1 %v1455_v5  ;;  %v1537_v5 = vld [vmem:[#allocation10 + $0xe8] sm:$0xff]  }
 0x15b   :  { %797 = vmatpush1.bf16.msra.mxu1 %v1453_v6  ;;  %v1538_v6 = vld [vmem:[#allocation10 + $0x28] sm:$0xff]  }
 0x15c   :  { %798 = vmatprep.subr.bf16.mxu1 %v1461_v7  ;;  %v1539_v7 = vld [vmem:[#allocation10 + $0xa8] sm:$0xff]  }
 0x15f   :  { %799 = vmatpush1.bf16.msra.mxu1 %v1459_v8  ;;  %v1540_v8 = vld [vmem:[#allocation10 + $0x70] sm:$0xff]  }
 0x160   :  { %800 = vmatprep.subr.bf16.mxu1 %v1467_v9  ;;  %v1541_v9 = vld [vmem:[#allocation10 + $0xf0] sm:$0xff]  }
 0x163   :  { %801 = vmatpush1.bf16.msra.mxu1 %v1465_v10  ;;  %v1542_v10 = vld [vmem:[#allocation10 + $0x30] sm:$0xff]  }
 0x164   :  { %802 = vmatprep.subr.bf16.mxu1 %v1473_v11  ;;  %v1543_v11 = vld [vmem:[#allocation10 + $0xb0] sm:$0xff]  }
 0x167   :  { %803 = vmatpush1.bf16.msra.mxu1 %v1471_v12  ;;  %v1544_v12 = vld [vmem:[#allocation10 + $0x78] sm:$0xff]  }
 0x168   :  { %804 = vmatprep.subr.bf16.mxu1 %v1479_v13  ;;  %v1545_v13 = vld [vmem:[#allocation10 + $0xf8] sm:$0xff]  }
 0x16b   :  { %805 = vmatpush1.bf16.msra.mxu1 %v1477_v14  ;;  %v1546_v14 = vld [vmem:[#allocation10 + $0x38] sm:$0xff]  }
 0x16c   :  { %806 = vmatprep.subr.bf16.mxu1 %v1485_v15  ;;  %v1547_v15 = vld [vmem:[#allocation10 + $0xb8] sm:$0xff]  }
 0x16f   :  { %807 = vmatpush1.bf16.msra.mxu1 %v1483_v16  ;;  %v415_v16 = vsub.s32 2, %v1831_v34 }
 0x170   :  { %808 = vmatprep.subr.bf16.mxu1 %v1491_v17  ;;  %v403_v17 = vld [vmem:[%s1872_s6] sm:$0xf] }
 0x173   :  { %809 = vmatpush1.bf16.msra.mxu1 %v1489_v18  ;;  %v419_v18 = vsub.s32 3, %v1831_v34 }
 0x174   :  { %810 = vmatprep.subr.bf16.mxu1 %v1497_v19  ;;  %v408_v19 = vrot.slane %v403_v17, %v206_v35 }
 0x177   :  { %811 = vmatpush1.bf16.msra.mxu1 %v1495_v20  ;;  %v416_v20 = vrot.slane %v403_v17, %v415_v16 }
 0x178   :  { %812 = vmatprep.subr.bf16.mxu1 %v1503_v21  ;;  %v412_v21 = vrot.slane %v403_v17, %v210_v37 }
 0x17b   :  { %813 = vmatpush1.bf16.msra.mxu1 %v1501_v22  ;;  %v420_v22 = vrot.slane %v403_v17, %v419_v18 }
 0x17c   :  { %814 = vmatprep.subr.bf16.mxu1 %v1509_v24 }
 0x17f   :  { %815 = vmatpush1.bf16.msra.mxu1 %v1507_v26 }
 0x180   :  { %816 = vmatprep.subr.bf16.mxu1 %v1515_v28 }
 0x183   :  { %817 = vmatpush1.bf16.msra.mxu1 %v1513_v30 }
 0x184   :  { %1343 = vmatprep.subr.bf16.mxu1 %v1517_v32 }
 0x219   :  { %v328_v40 = vpop.f32.mrb[0].mxu1 }
 0x21a   :  { %v329_v41 = vadd.f32 %v328_v40, %v207_v38  ;;  %v330_v42 = vpop.f32.mrb[1].mxu1 }
 0x21b   :  { %v331_v43 = vadd.f32 %v330_v42, %v211_v39  ;;  %v332_v44 = vpop.f32.mrb[2].mxu1 }
 0x21c   :  { %v335_v45 = vmax.f32 %v329_v41, 0.0  ;;  %v333_v46 = vpop.f32.mrb[3].mxu1 }
 0x21d   :  { %v336_v47 = vmax.f32 %v331_v43, 0.0 }
 0x21e   :  { %v337_v51 = vpack.c.bf16 %v335_v45, %v335_v45  ;;  %v1283_v45 = vld [vmem:[%s1874_s8] ss:$0 sm:$0xff] }
 0x21f   :  { %v338_v48 = vpack.c.bf16 %v336_v47, %v336_v47 }
 0x221   :  { %777 = vmatprep.mubr.bf16.mxu0 %v338_v48  ;;  %818 = vmatprep.mubr.bf16.mxu1 %v338_v48 }
 0x222   :  { %778 = vmatmul.mubr.bf16.vlgmr.msra.gmra.mrb[4].mxu0 %v337_v51  ;;  %819 = vmatmul.mubr.bf16.vlgmr.msra.gmra.mrb[4].mxu1 %v337_v51 }
 0x223   :  { %1322 = vmatpush3.bf16.msra.mxu0 %v1518_v49  ;;  %1344 = vmatpush3.bf16.msra.mxu1 %v1519_v50 }
 0x224   :  { %1323 = vmatprep.subr.bf16.mxu0 %v1520_v52  ;;  %1345 = vmatprep.subr.bf16.mxu1 %v1521_v53 }
 0x227   :  { %1324 = vmatpush3.bf16.msra.mxu0 %v1522_v54  ;;  %1346 = vmatpush3.bf16.msra.mxu1 %v1523_v55 }
 0x228   :  { %1325 = vmatprep.subr.bf16.mxu0 %v1524_v56  ;;  %1347 = vmatprep.subr.bf16.mxu1 %v1525_v57 }
 0x22b   :  { %1326 = vmatpush3.bf16.msra.mxu0 %v1526_v58  ;;  %1348 = vmatpush3.bf16.msra.mxu1 %v1527_v59 }
 0x22c   :  { %1327 = vmatprep.subr.bf16.mxu0 %v1528_v60  ;;  %1349 = vmatprep.subr.bf16.mxu1 %v1529_v61 }
 0x22f   :  { %1328 = vmatpush3.bf16.msra.mxu0 %v1530_v62  ;;  %1350 = vmatpush3.bf16.msra.mxu1 %v1531_v63 }
 0x230   :  { %1329 = vmatprep.subr.bf16.mxu0 %v1532_v0  ;;  %1351 = vmatprep.subr.bf16.mxu1 %v1533_v1 }
 0x233   :  { %1330 = vmatpush3.bf16.msra.mxu0 %v1534_v2  ;;  %1352 = vmatpush3.bf16.msra.mxu1 %v1535_v3 }
 0x234   :  { %1331 = vmatprep.subr.bf16.mxu0 %v1536_v4  ;;  %1353 = vmatprep.subr.bf16.mxu1 %v1537_v5 }
 0x237   :  { %1332 = vmatpush3.bf16.msra.mxu0 %v1538_v6  ;;  %1354 = vmatpush3.bf16.msra.mxu1 %v1539_v7 }
 0x238   :  { %1333 = vmatprep.subr.bf16.mxu0 %v1540_v8  ;;  %1355 = vmatprep.subr.bf16.mxu1 %v1541_v9 }
 0x23b   :  { %1334 = vmatpush3.bf16.msra.mxu0 %v1542_v10  ;;  %1356 = vmatpush3.bf16.msra.mxu1 %v1543_v11 }
 0x23c   :  { %1335 = vmatprep.subr.bf16.mxu0 %v1544_v12  ;;  %1357 = vmatprep.subr.bf16.mxu1 %v1545_v13 }
 0x23f   :  { %1336 = vmatpush3.bf16.msra.mxu0 %v1546_v14  ;;  %1358 = vmatpush3.bf16.msra.mxu1 %v1547_v15 }
 0x2f5   :  { %v779_v23 = vpop.f32.mrb[4].mxu0  ;;  %v820_v24 = vpop.f32.mrb[4].mxu1 }
 0x2f6   :  { %v780_v25 = vadd.f32 %v779_v23, %v408_v19  ;;  %v821_v26 = vadd.f32 %v820_v24, %v416_v20  ;;  %v781_v27 = vpop.f32.mrb[5].mxu0  ;;  %v822_v28 = vpop.f32.mrb[5].mxu1 }
 0x2f7   :  { %v782_v29 = vadd.f32 %v781_v27, %v412_v21  ;;  %v823_v30 = vadd.f32 %v822_v28, %v420_v22  ;;  %v783_v31 = vpop.f32.mrb[6].mxu0  ;;  %v824_v32 = vpop.f32.mrb[6].mxu1 }
 0x2f8   :  { %v827_v33 = vmax.f32 %v780_v25, 0.0  ;;  %v829_v36 = vmax.f32 %v821_v26, 0.0  ;;  %v784_v38 = vpop.f32.mrb[7].mxu0  ;;  %v825_v39 = vpop.f32.mrb[7].mxu1 }
 0x2f9   :  { %v828_v35 = vmax.f32 %v782_v29, 0.0  ;;  %v830_v40 = vmax.f32 %v823_v30, 0.0 }
 0x2fa   :  { %v831_v37 = vpack.c.bf16 %v827_v33, %v827_v33  ;;  %v833_v42 = vpack.c.bf16 %v829_v36, %v829_v36 }
 0x2fb   :  { %v832_v41 = vpack.c.bf16 %v828_v35, %v828_v35  ;;  %v834_v34 = vpack.c.bf16 %v830_v40, %v830_v40 }
 0x2fd   :  { %1130 = vmatprep.mubr.bf16.mxu0 %v832_v41  ;;  %1170 = vmatprep.mubr.bf16.mxu1 %v834_v34 }
 0x2fe   :  { %1131 = vmatmul.mubr.bf16.vlgmr.msra.gmra.mrb[8].mxu0 %v831_v37  ;;  %1171 = vmatmul.mubr.bf16.vlgmr.msra.gmra.mrb[8].mxu1 %v833_v42 }
 0x3d1   :  { %v1337_v43 = vpop.f32.mrb[8].mxu0  ;;  %v1359_v44 = vpop.f32.mrb[8].mxu1 }
 0x3d2   :  { %v1338_v46 = vpop.f32.mrb[9].mxu0  ;;  %v1360_v47 = vpop.f32.mrb[9].mxu1 }
 0x3d3   :  { %v1339_v48 = vadd.f32 %v1338_v46, %v1337_v43  ;;  %v1361_v49 = vadd.f32 %v1360_v47, %v1359_v44  ;;  %v1340_v50 = vpop.f32.mrb[10].mxu0  ;;  %v1362_v51 = vpop.f32.mrb[10].mxu1 }
 0x3d4   :  { %v1341_v52 = vpop.f32.mrb[11].mxu0  ;;  %v1363_v53 = vpop.f32.mrb[11].mxu1 }
 0x3d5   :  { %v1133_v54 = vadd.f32 %v1339_v48, %v1283_v45 }
 0x3d7   :  { %v1173_v55 = vadd.f32 %v1361_v49, %v1133_v54 }
 0x3d9   :  { %1548 = vtanh.f32 %v1173_v55 }
 0x3e3   :  { %v1549_v56 = vpop.eup %1548 }
 0x3e4   :  { %1179 = vst [vmem:[#allocation11] sm:$0xff] %v1549_v56 }
 0x3e5   :  { %1671 = shalt.err (!%p1668_p2)
}
 0x3e6   :  { %s1672_s15 = scalar_lea.hbm %s1875_s9, 128 }
 0x3e7   :  { %p1673_p3 = scmp.ne.s32.totalorder %s1875_s9, %s1672_s15  ;;  %p1676_p4 = scmp.lt.u32.totalorder %s1672_s15, %s1875_s9 }
 0x3e9   :  { %p1678_p5 = pnand %p1676_p4, %p1673_p3 }
 0x3eb   :  { %1681 = shalt.err (!%p1678_p5)
}
 0x3ec   :  { %1189 = dma.vmem_to_hbm [thread:$0]  %s1187_s10, 128, %s1875_s9, [#allocation4]  }
 0x3ed   :  { %1688 = dma.done.wait [#allocation4], 128  }
 0x3ee   :  { %1689 = vsyncadd [#allocation4], 4294967168 }
 0x3ef   :  { %1193 = vsyncpa [#allocation3], 1 }
 0x3f0   :  { %1194 = vsyncpa [#allocation6], 1 }
 0x3f1   :  { %1195 = vsyncpa [#allocation9], 1 }
 0x3f2   :  { %1196 = vsyncpa [#allocation4], 1 }

</bundles_post_ra>
